<compile_context>
chip_gen: v5e
topology: v5e:2x2
jax: 0.10.0
libtpu: 0.0.40
codegen_flags: <defaults>
</compile_context>

<pallas_src>
import functools
import math

import jax
import jax.numpy as jnp
from jax.experimental import pallas as pl
from jax.experimental.pallas import tpu as pltpu


def _round_up(n, m):
    return ((n + m - 1) // m) * m


def _add_pe_kernel(x_ref, pe_ref, o_ref):
    # x_ref / o_ref: (ts, B*D) tiles in x.dtype; pe_ref: (ts, B*D) float32 tile.
    # dropout p = 0.0 -> identity (no mask).  Add in float32, matching the PyTorch buffer.
    o_ref[...] = (x_ref[...].astype(jnp.float32) + pe_ref[...]).astype(o_ref.dtype)


@functools.lru_cache(maxsize=8)
def _pe_flat_buffer(max_len, d_model, batch):
    """(max_len, batch*d_model) float32 buffer == PyTorch register_buffer('pe'), tiled over batch.

    Note the module uses log(1000), not log(10000).  Assumes even d_model (the PyTorch
    construction itself shape-mismatches for odd d_model).  Cached so the sin/exp graph and
    its HBM write happen once, not per forward call.
    """
    position = jnp.arange(max_len, dtype=jnp.float32)[:, None]                 # (L, 1)
    div_term = jnp.exp(jnp.arange(0, d_model, 2, dtype=jnp.float32)
                       * (-(math.log(1000.0) / d_model)))                      # (D//2,)
    angles = position * div_term                                               # (L, D//2)
    pe = jnp.stack([jnp.sin(angles), jnp.cos(angles)], axis=-1)                # even=sin, odd=cos
    pe = pe.reshape(max_len, d_model)                                          # (L, D)
    pe = jnp.tile(pe, (1, batch))                                              # (L, B*D), matches x.reshape(S, B*D)
    return jax.device_put(pe)


def positional_encoding(x, *, max_len=500, tile_bytes=6 << 20, vmem_budget=48 << 20):
    """x: (seq_len, batch, d_model) -> same shape.  out = x + pe[:seq_len] (dropout p=0)."""
    S, B, D = x.shape
    assert S <= max_len, "seq_len exceeds max_len of the positional-encoding buffer"
    assert D % 2 == 0, "d_model must be even (as in the PyTorch module)"

    BD = B * D
    x2 = x.reshape(S, BD)                                   # free contiguous view, lane-dense
    pe = _pe_flat_buffer(max_len, D, B)[:S]                 # (S, BD) float32

    # Padded per-sequence-row VMEM bytes (lanes rounded to 128; ts kept a multiple of 8).
    lanes = _round_up(BD, 128)
    x_row_bytes = lanes * x.dtype.itemsize
    pe_row_bytes = lanes * 4
    row_bytes = 2 * x_row_bytes + pe_row_bytes              # x-in + out + pe per row

    # Sequence tile size:
    #   ~tile_bytes of x per step, >= ~4 grid steps when S allows, padded double-buffered
    #   footprint within vmem_budget, and multiple of 8 (or == S) for the (8,128) rule.
    ts = tile_bytes // max(1, x_row_bytes)
    ts = min(ts, max(8, -(-S // 4)))                        # aim for >= 4 steps on v7x megacore
    ts = min(ts, vmem_budget // (2 * row_bytes))            # double-buffered footprint cap
    ts = max(8, (ts // 8) * 8)
    if S < ts:
        ts = S                                              # full-extent block is always legal
    grid = (pl.cdiv(S, ts),)

    ts_pad = _round_up(ts, 8)
    vmem_limit = min(2 * ts_pad * row_bytes + (4 << 20), 60 << 20)

    out2 = pl.pallas_call(
        _add_pe_kernel,
        out_shape=jax.ShapeDtypeStruct((S, BD), x.dtype),
        grid=grid,
        in_specs=[
            pl.BlockSpec((ts, BD), lambda i: (i, 0)),       # x tile (dense)
            pl.BlockSpec((ts, BD), lambda i: (i, 0)),       # pe tile (dense, f32)
        ],
        out_specs=pl.BlockSpec((ts, BD), lambda i: (i, 0)),
        compiler_params=pltpu.CompilerParams(
            dimension_semantics=("parallel",),
            vmem_limit_bytes=int(vmem_limit),
        ),
    )(x2, pe)
    return out2.reshape(S, B, D)


def positional_encoding_ref(x, max_len=500):
    """Pure-JAX reference mirroring the PyTorch buffer construction."""
    S, B, D = x.shape
    position = jnp.arange(max_len, dtype=jnp.float32)[:, None]
    div_term = jnp.exp(jnp.arange(0, D, 2, dtype=jnp.float32) * (-(math.log(1000.0) / D)))
    pe = jnp.zeros((max_len, 1, D), dtype=jnp.float32)
    pe = pe.at[:, 0, 0::2].set(jnp.sin(position * div_term))
    pe = pe.at[:, 0, 1::2].set(jnp.cos(position * div_term))
    return (x.astype(jnp.float32) + pe[:S]).astype(x.dtype)


if __name__ == "__main__":
    # Small shapes consistent with the module (sequence-first layout).
    seq_len, batch, d_model = 8, 2, 32
    key = jax.random.PRNGKey(0)
    x = jax.random.normal(key, (seq_len, batch, d_model), dtype=jnp.float32)

    out = jax.block_until_ready(positional_encoding(x))
    ref = positional_encoding_ref(x)
    assert out.shape == x.shape and out.dtype == x.dtype
    assert jnp.allclose(out, ref, atol=1e-5, rtol=1e-5)

    # Lane-dense case (B*D = 256) with a small tile_bytes forcing a multi-step sequence grid
    # (ts = 8 -> 8 pipelined steps).
    x2 = jax.random.normal(jax.random.PRNGKey(0), (64, 2, 128), dtype=jnp.float32)
    out2 = jax.block_until_ready(positional_encoding(x2, tile_bytes=8 * 1024))
    assert jnp.allclose(out2, positional_encoding_ref(x2), atol=1e-5, rtol=1e-5)

    # Ragged edge: S not a multiple of ts -> partial (masked) last block.
    x3 = jax.random.normal(jax.random.PRNGKey(0), (20, 2, 128), dtype=jnp.float32)
    out3 = jax.block_until_ready(positional_encoding(x3, tile_bytes=8 * 1024))
    assert jnp.allclose(out3, positional_encoding_ref(x3), atol=1e-5, rtol=1e-5)

    print("KERNEL_OK")
</pallas_src>

<mosaic_0001>
module attributes {stable_mosaic.version = 11 : i64} {
  func.func @_add_pe_kernel(%arg0: i32, %arg1: memref<8x64xf32, #tpu.memory_space<vmem>>, %arg2: memref<8x64xf32, #tpu.memory_space<vmem>>, %arg3: memref<8x64xf32, #tpu.memory_space<vmem>>) attributes {dimension_semantics = [#tpu.dimension_semantics<parallel>], iteration_bounds = array<i64: 1>, scalar_prefetch = 0 : i64, scratch_operands = 0 : i64, tpu.core_type = #tpu.core_type<tc>, window_params = [{transform_indices = @transform_0, window_bounds = array<i64: 8, 64>}, {transform_indices = @transform_1, window_bounds = array<i64: 8, 64>}, {transform_indices = @transform_2, window_bounds = array<i64: 8, 64>}]} {
    %c0 = arith.constant 0 : index
    %c0_0 = arith.constant 0 : index
    %0 = vector.load %arg1[%c0, %c0_0] : memref<8x64xf32, #tpu.memory_space<vmem>>, vector<8x64xf32>
    %c0_1 = arith.constant 0 : index
    %c0_2 = arith.constant 0 : index
    %1 = vector.load %arg2[%c0_1, %c0_2] : memref<8x64xf32, #tpu.memory_space<vmem>>, vector<8x64xf32>
    %2 = arith.addf %0, %1 : vector<8x64xf32>
    %c0_3 = arith.constant 0 : index
    %c0_4 = arith.constant 0 : index
    %3 = vector.load %arg3[%c0_3, %c0_4] : memref<8x64xf32, #tpu.memory_space<vmem>>, vector<8x64xf32>
    tpu.vector_store %arg3[%c0_3, %c0_4], %2 {strides = array<i32>} : memref<8x64xf32, #tpu.memory_space<vmem>>, vector<8x64xf32>,
    return
  }
  func.func @transform_0(%arg0: i32) -> (i32, i32) {
    %c0_i32 = arith.constant 0 : i32
    %c0_i32_0 = arith.constant 0 : i32
    return %arg0, %c0_i32 : i32, i32
  }
  func.func @transform_1(%arg0: i32) -> (i32, i32) {
    %c0_i32 = arith.constant 0 : i32
    %c0_i32_0 = arith.constant 0 : i32
    return %arg0, %c0_i32 : i32, i32
  }
  func.func @transform_2(%arg0: i32) -> (i32, i32) {
    %c0_i32 = arith.constant 0 : i32
    %c0_i32_0 = arith.constant 0 : i32
    return %arg0, %c0_i32 : i32, i32
  }
}

</mosaic_0001>

<bundles_post_ra>
// kernel: tpu_custom_call.1
= control target key start
LH: loop header
LB: loop body
LE: loop exit
PB: predicated region body
PF: predicated region fallthrough
CT: control target
= control target key end

     0   :  { %7 = vsyncpa [#allocation3], 0  ;;  %s171_s0 = inlined_call_operand.hbm [shape: f32[8,64], index: 0, kind: input, shape index: {}]   ;;  %s172_s1 = inlined_call_operand.hbm [shape: f32[8,64], index: 1, kind: input, shape index: {}]   ;;  %s173_s2 = inlined_call_operand.hbm [shape: f32[8,64], index: 2, kind: output, shape index: {}]  }
   0x1   :  { %8 = vsyncpa [#allocation6], 0 }
   0x2   :  { %9 = vsyncpa [#allocation4], 0  ;;  %s15_s11 = sshll.u32 %s171_s0, 4  ;;  %s144_s12 = smov [#allocation2]   ;;  %s16_s11 = int_to_ptr.hbm [resolvable:$true] %s15_s11 }
   0x3   :  { %s17_s13 = sshll.u32 %s144_s12, 4  ;;  %s26_s16 = sshll.u32 %s172_s1, 4  ;;  %s18_s13 = int_to_ptr.vmem [resolvable:$true] %s17_s13  ;;  %s27_s16 = int_to_ptr.hbm [resolvable:$true] %s26_s16 }
   0x4   :  { %20 = dma.hbm_to_vmem [thread:$0]  %s16_s11, 128, %s18_s13, [#allocation3]  }
   0x5   :  { %s145_s17 = smov [#allocation5]  }
   0x6   :  { %s28_s18 = sshll.u32 %s145_s17, 4  ;;  %s29_s18 = int_to_ptr.vmem [resolvable:$true] %s28_s18 }
   0x7   :  { %31 = dma.hbm_to_vmem [thread:$0]  %s27_s16, 128, %s29_s18, [#allocation6]  }
   0x8   :  { %138 = dma.done.wait [#allocation3], 128  }
   0x9   :  { %139 = vsyncadd [#allocation3], 4294967168 }
   0xa   :  { %140 = dma.done.wait [#allocation6], 128  }
   0xb   :  { %141 = vsyncadd [#allocation6], 4294967168  ;;  %s146_s19 = smov [#allocation7]   ;;  %s52_s22 = sshll.u32 %s173_s2, 4  ;;  %v40_v0 = vld [vmem:[#allocation2] sm:$0xff]  ;;  %v41_v1 = vld [vmem:[#allocation5] sm:$0xff]  ;;  %s53_s22 = int_to_ptr.hbm [resolvable:$true] %s52_s22 }
   0xc   :  { %s50_s0 = sshll.u32 %s146_s19, 4  ;;  %vm43_vm0 = vcmask 523264   ;;  %v42_v2 = vadd.f32 %v41_v1, %v40_v0  ;;  %s51_s0 = int_to_ptr.vmem [resolvable:$true] %s50_s0 }
   0xe   :  { %44 = vst.msk [vmem:[#allocation7] sm:$0xff] %vm43_vm0, %v42_v2 }
   0xf   :  { %55 = dma.vmem_to_hbm [thread:$0]  %s51_s0, 128, %s53_s22, [#allocation4]  }
  0x10   :  { %142 = dma.done.wait [#allocation4], 128  }
  0x11   :  { %143 = vsyncadd [#allocation4], 4294967168 }
  0x12   :  { %60 = vsyncpa [#allocation3], 1 }
  0x13   :  { %61 = vsyncpa [#allocation6], 1 }
  0x14   :  { %62 = vsyncpa [#allocation4], 1 }

</bundles_post_ra>
